<compile_context>
chip_gen: v5e
topology: v5e:2x2
jax: 0.10.0
libtpu: 0.0.40
codegen_flags: <defaults>
</compile_context>

<pallas_src>
import functools

import jax
import jax.numpy as jnp
import numpy as np
from jax import lax
from jax.experimental import pallas as pl
from jax.experimental.pallas import tpu as pltpu

_LANE = 128


def _round_up(x: int, m: int) -> int:
    return ((x + m - 1) // m) * m


def _tpu_vmem_capacity() -> int:
    try:
        cap = getattr(pltpu.get_tpu_info(), "vmem_capacity_bytes", None)
        if cap:
            return int(cap)
    except Exception:
        pass
    return 64 * 1024 * 1024  # conservative (v7x)


def _pick_tiling(R, C, logit_bytes, tgt_bytes, max_tile_rows=None):
    """Pick rows-per-tile (spatial tile = tile_r*128 px) per TPU generation."""
    vmem_cap = _tpu_vmem_capacity()
    big_vmem = vmem_cap >= 100 * 1024 * 1024              # v5e / v6e (128 MiB)
    if max_tile_rows is not None:
        max_rows = max(32, _round_up(max_tile_rows, 32))
    else:
        max_rows = 1024 if big_vmem else 512               # 131072 / 65536 px tiles
    vmem_limit = (64 if big_vmem else 40) * 1024 * 1024

    def footprint(rows):
        px = rows * _LANE
        return (2 * (C * px * logit_bytes + px * tgt_bytes)  # double-buffered inputs
                + 4 * C * px * 4)                            # live f32 intermediates

    rows = max_rows
    while rows > 32 and footprint(rows) > vmem_limit // 2:
        rows //= 2
    rows = max(32, rows - rows % 32)                         # keep int8-safe row tiling

    if R <= rows:
        # Single row-block: block dims == full array dims (allowed for any R / dtype).
        return R, 1, vmem_limit
    return rows, pl.cdiv(R, rows), vmem_limit


# ----------------------------------------------------------------------------
# Kernel: per-(batch, row-tile) dice statistics, accumulated over the k axis.
# ----------------------------------------------------------------------------
def _dice_kernel(logits_ref, tgt_ref, out_ref, *,
                 num_classes, hw, tile_r, n_k, needs_mask):
    # logits_ref: (1, C, tile_r, 128)  f32 / bf16 logits (lane-dense spatial layout)
    # tgt_ref   : (1, 1, tile_r, 128)  int8 / uint8 / int32 class labels
    # out_ref   : (1, 3, C, 128)       f32 lane-wise partials, resident across k:
    #                                  [0]=intersection, [1]=sum(probs), [2]=sum(onehot)
    C = num_classes
    k = pl.program_id(1)

    @pl.when(k == 0)
    def _init():
        out_ref[...] = jnp.zeros_like(out_ref)

    # Class axis as a statically-unrolled loop over full-density (tile_r, 128) slabs.
    slabs = [logits_ref[0, c].astype(jnp.float32) for c in range(C)]
    tgt = tgt_ref[0, 0].astype(jnp.int32)

    if C == 2:
        # Sigmoid fast path: one exp + one EUP reciprocal per pixel.
        e = jnp.exp(slabs[0] - slabs[1])
        p1 = pl.reciprocal(1.0 + e, approx=True)
        probs = [1.0 - p1, p1]
    else:
        m = slabs[0]
        for c in range(1, C):
            m = jnp.maximum(m, slabs[c])
        exs = [jnp.exp(s - m) for s in slabs]
        den = exs[0]
        for c in range(1, C):
            den = den + exs[c]
        inv = pl.reciprocal(den, approx=True)      # EUP; probs sum to 1 +- ~1e-3
        probs = [e * inv for e in exs]

    # One-hot as bool compares (no materialized f32 one-hot).  Labels outside
    # [0, C) simply contribute nothing (PyTorch's F.one_hot would raise).
    hits = [tgt == c for c in range(C)]

    def _accumulate(mask_tail):
        if mask_tail:
            # Mask pixels past the true H*W extent (lane-pad of the last real row
            # and/or OOB rows of a partial last row-block).  Select-based so that
            # garbage (even NaN/Inf) in OOB rows never propagates.
            row = lax.broadcasted_iota(jnp.int32, (tile_r, _LANE), 0)
            lane = lax.broadcasted_iota(jnp.int32, (tile_r, _LANE), 1)
            valid = (k * tile_r + row) * _LANE + lane < hw
        inter, psum, tsum = [], [], []
        for c in range(C):
            p, h = probs[c], hits[c]
            if mask_tail:
                h = jnp.logical_and(h, valid)
                p = jnp.where(valid, p, 0.0)
            inter.append(jnp.sum(jnp.where(h, p, 0.0), axis=0, keepdims=True))
            psum.append(jnp.sum(p, axis=0, keepdims=True))
            tsum.append(jnp.sum(h.astype(jnp.float32), axis=0, keepdims=True))
        # Lane-wise (C, 128) partial sums; the final 128-lane reduction happens once
        # in the wrapper -> no per-tile cross-lane XLU reduce, no sub-lane RMWs.
        out_ref[0, 0] += jnp.concatenate(inter, axis=0)
        out_ref[0, 1] += jnp.concatenate(psum, axis=0)
        out_ref[0, 2] += jnp.concatenate(tsum, axis=0)

    if not needs_mask:
        _accumulate(False)
    elif n_k == 1:
        _accumulate(True)
    else:
        # Masking only runs on the last row-tile; interior tiles pay nothing.
        @pl.when(k < n_k - 1)
        def _body():
            _accumulate(False)

        @pl.when(k == n_k - 1)
        def _tail():
            _accumulate(True)


def _dice_stats(logits3, tgt3, *, max_tile_rows=None):
    """logits3: (B, C, HW), tgt3: (B, 1, HW) int -> (B, 3, C, 128) f32 lane partials."""
    B, C, HW = logits3.shape
    hw128 = _round_up(HW, _LANE)
    if hw128 != HW:
        # Only a <=127-element tail pad; common segmentation sizes need no pad at all.
        logits3 = jnp.pad(logits3, ((0, 0), (0, 0), (0, hw128 - HW)))
        tgt3 = jnp.pad(tgt3, ((0, 0), (0, 0), (0, hw128 - HW)))
    R = hw128 // _LANE
    logits4 = logits3.reshape(B, C, R, _LANE)
    tgt4 = tgt3.reshape(B, 1, R, _LANE)

    tile_r, n_k, vmem_limit = _pick_tiling(
        R, C, logits4.dtype.itemsize, tgt4.dtype.itemsize, max_tile_rows)
    needs_mask = (n_k * tile_r * _LANE != HW)

    kernel = functools.partial(
        _dice_kernel, num_classes=C, hw=HW, tile_r=tile_r, n_k=n_k,
        needs_mask=needs_mask)

    n_exp = 1 if C == 2 else C
    cost = pl.CostEstimate(
        flops=12 * B * C * hw128,
        transcendentals=B * hw128 * n_exp,
        bytes_accessed=(B * C * hw128 * logits4.dtype.itemsize
                        + B * hw128 * tgt4.dtype.itemsize
                        + B * 3 * C * _LANE * 4),
    )

    return pl.pallas_call(
        kernel,
        out_shape=jax.ShapeDtypeStruct((B, 3, C, _LANE), jnp.float32),
        grid_spec=pltpu.PrefetchScalarGridSpec(
            num_scalar_prefetch=0,
            grid=(B, n_k),
            in_specs=[
                pl.BlockSpec((1, C, tile_r, _LANE), lambda b, k: (b, 0, k, 0)),
                pl.BlockSpec((1, 1, tile_r, _LANE), lambda b, k: (b, 0, k, 0)),
            ],
            out_specs=pl.BlockSpec((1, 3, C, _LANE), lambda b, k: (b, 0, 0, 0)),
        ),
        compiler_params=pltpu.CompilerParams(
            dimension_semantics=("parallel", "arbitrary"),
            vmem_limit_bytes=vmem_limit,
        ),
        cost_estimate=cost,
    )(logits4, tgt4)


def dice_loss(predictions, targets, *, num_classes, smooth=1e-5, max_tile_rows=None):
    """Functional entry point (max_tile_rows is a tuning/test knob)."""
    B, C, H, W = predictions.shape
    assert C == num_classes, "channel dim must equal num_classes"
    HW = H * W
    logits3 = predictions.reshape(B, C, HW)
    # int8/uint8 targets are the low-HBM-traffic fast path; int32 passes through
    # without an extra cast; anything else is downcast to int32.
    if targets.dtype not in (np.dtype(np.int8), np.dtype(np.uint8), np.dtype(np.int32)):
        targets = targets.astype(jnp.int32)
    tgt3 = targets.reshape(B, 1, HW)

    stats = _dice_stats(logits3, tgt3, max_tile_rows=max_tile_rows)  # (B, 3, C, 128)
    stats = jnp.sum(stats, axis=-1)                                  # (B, 3, C)
    inter, psum, tsum = stats[:, 0], stats[:, 1], stats[:, 2]
    dice = (2.0 * inter + smooth) / (psum + tsum + smooth)
    return 1.0 - jnp.mean(dice)


class DiceLoss:
    """Pallas-TPU port of DiceLoss (softmax over classes + per-class dice over H*W)."""

    def __init__(self, num_classes: int = 2, smooth: float = 1e-5):
        self.num_classes = num_classes
        self.smooth = smooth

    def __call__(self, predictions, targets):
        return dice_loss(predictions, targets,
                         num_classes=self.num_classes, smooth=self.smooth)


# ----------------------------------------------------------------------------
# Pure-JAX reference (for correctness check only).
# ----------------------------------------------------------------------------
def _ref_dice_loss(predictions, targets, num_classes, smooth=1e-5):
    probs = jax.nn.softmax(predictions.astype(jnp.float32), axis=1)
    onehot = jax.nn.one_hot(targets, num_classes, axis=1, dtype=jnp.float32)
    inter = jnp.sum(probs * onehot, axis=(2, 3))
    union = jnp.sum(probs, axis=(2, 3)) + jnp.sum(onehot, axis=(2, 3))
    dice = (2.0 * inter + smooth) / (union + smooth)
    return 1.0 - jnp.mean(dice)


if __name__ == "__main__":
    key = jax.random.PRNGKey(0)
    ks = jax.random.split(key, 8)

    def check(loss, ref, name):
        assert np.allclose(np.asarray(loss), np.asarray(ref), rtol=2e-3, atol=2e-3), (
            name, float(loss), float(ref))

    # ---- case 1: f32 logits, C=4, 16x16 (single row-block) ----
    B, C, H, W = 2, 4, 16, 16
    logits = jax.random.normal(ks[0], (B, C, H, W), jnp.float32)
    targets = jax.random.randint(ks[1], (B, H, W), 0, C, jnp.int32)
    loss_fn = DiceLoss(num_classes=C)
    loss = jax.block_until_ready(loss_fn(logits, targets))
    check(loss, _ref_dice_loss(logits, targets, C), "f32_c4")

    # ---- case 2: ragged spatial size (13x11) -> lane-tail masking ----
    H2, W2 = 13, 11
    logits2 = jax.random.normal(ks[2], (B, C, H2, W2), jnp.float32)
    targets2 = jax.random.randint(ks[3], (B, H2, W2), 0, C, jnp.int32)
    loss2 = jax.block_until_ready(loss_fn(logits2, targets2))
    check(loss2, _ref_dice_loss(logits2, targets2, C), "ragged")

    # ---- case 3: bf16 logits (half the HBM traffic; kernel upcasts) ----
    logits_bf16 = logits.astype(jnp.bfloat16)
    loss3 = jax.block_until_ready(loss_fn(logits_bf16, targets))
    check(loss3, _ref_dice_loss(logits_bf16.astype(jnp.float32), targets, C), "bf16")

    # ---- case 4: num_classes == 2 sigmoid fast path ----
    C2 = 2
    logits4 = jax.random.normal(ks[4], (B, C2, H, W), jnp.float32)
    targets4 = jax.random.randint(ks[5], (B, H, W), 0, C2, jnp.int32)
    loss4 = jax.block_until_ready(DiceLoss(num_classes=C2)(logits4, targets4))
    check(loss4, _ref_dice_loss(logits4, targets4, C2), "c2_fast")

    # ---- case 5: B=1, int8 targets, forced small tile -> multi-tile accumulation,
    # unmasked + masked pl.when branches, partial (OOB) last row-block ----
    H5, W5 = 72, 72
    logits5 = jax.random.normal(ks[6], (1, C, H5, W5), jnp.float32)
    targets5 = jax.random.randint(ks[7], (1, H5, W5), 0, C, jnp.int32).astype(jnp.int8)
    loss5 = jax.block_until_ready(
        dice_loss(logits5, targets5, num_classes=C, max_tile_rows=32))
    check(loss5, _ref_dice_loss(logits5, targets5.astype(jnp.int32), C), "int8_multitile")

    print("KERNEL_OK")
</pallas_src>

<mosaic_0001>
module attributes {stable_mosaic.version = 11 : i64} {
  func.func @_dice_kernel(%arg0: i32, %arg1: i32, %arg2: memref<1x4x2x128xf32, #tpu.memory_space<vmem>>, %arg3: memref<1x1x2x128xi32, #tpu.memory_space<vmem>>, %arg4: memref<1x3x4x128xf32, #tpu.memory_space<vmem>>) attributes {dimension_semantics = [#tpu.dimension_semantics<parallel>, #tpu.dimension_semantics<arbitrary>], iteration_bounds = array<i64: 2, 1>, scalar_prefetch = 0 : i64, scratch_operands = 0 : i64, tpu.core_type = #tpu.core_type<tc>, window_params = [{transform_indices = @transform_0, window_bounds = array<i64: 1, 4, 2, 128>}, {transform_indices = @transform_1, window_bounds = array<i64: 1, 1, 2, 128>}, {transform_indices = @transform_2, window_bounds = array<i64: 1, 3, 4, 128>}]} {
    %c0_i32 = arith.constant 0 : i32
    %0 = arith.cmpi eq, %arg1, %c0_i32 : i32
    %1 = arith.extui %0 : i1 to i32
    %c0_i32_0 = arith.constant 0 : i32
    %2 = arith.cmpi ne, %1, %c0_i32_0 : i32
    scf.if %2 {
      %cst_57 = arith.constant 0.000000e+00 : f32
      %101 = vector.broadcast %cst_57 : f32 to vector<1x3x4x128xf32>
      %c0_58 = arith.constant 0 : index
      %c0_59 = arith.constant 0 : index
      %c0_60 = arith.constant 0 : index
      %c0_61 = arith.constant 0 : index
      %102 = vector.load %arg4[%c0_58, %c0_59, %c0_60, %c0_61] : memref<1x3x4x128xf32, #tpu.memory_space<vmem>>, vector<1x3x4x128xf32>
      tpu.vector_store %arg4[%c0_58, %c0_59, %c0_60, %c0_61], %101 {strides = array<i32>} : memref<1x3x4x128xf32, #tpu.memory_space<vmem>>, vector<1x3x4x128xf32>,
    } else {
    }
    %c0 = arith.constant 0 : index
    %c0_1 = arith.constant 0 : index
    %c0_2 = arith.constant 0 : index
    %c0_3 = arith.constant 0 : index
    %3 = vector.load %arg2[%c0, %c0_1, %c0_2, %c0_3] : memref<1x4x2x128xf32, #tpu.memory_space<vmem>>, vector<1x1x2x128xf32>
    %4 = vector.shape_cast %3 : vector<1x1x2x128xf32> to vector<2x128xf32>
    %c0_4 = arith.constant 0 : index
    %c1 = arith.constant 1 : index
    %c0_5 = arith.constant 0 : index
    %c0_6 = arith.constant 0 : index
    %5 = vector.load %arg2[%c0_4, %c1, %c0_5, %c0_6] : memref<1x4x2x128xf32, #tpu.memory_space<vmem>>, vector<1x1x2x128xf32>
    %6 = vector.shape_cast %5 : vector<1x1x2x128xf32> to vector<2x128xf32>
    %c0_7 = arith.constant 0 : index
    %c2 = arith.constant 2 : index
    %c0_8 = arith.constant 0 : index
    %c0_9 = arith.constant 0 : index
    %7 = vector.load %arg2[%c0_7, %c2, %c0_8, %c0_9] : memref<1x4x2x128xf32, #tpu.memory_space<vmem>>, vector<1x1x2x128xf32>
    %8 = vector.shape_cast %7 : vector<1x1x2x128xf32> to vector<2x128xf32>
    %c0_10 = arith.constant 0 : index
    %c3 = arith.constant 3 : index
    %c0_11 = arith.constant 0 : index
    %c0_12 = arith.constant 0 : index
    %9 = vector.load %arg2[%c0_10, %c3, %c0_11, %c0_12] : memref<1x4x2x128xf32, #tpu.memory_space<vmem>>, vector<1x1x2x128xf32>
    %10 = vector.shape_cast %9 : vector<1x1x2x128xf32> to vector<2x128xf32>
    %c0_13 = arith.constant 0 : index
    %c0_14 = arith.constant 0 : index
    %c0_15 = arith.constant 0 : index
    %c0_16 = arith.constant 0 : index
    %11 = vector.load %arg3[%c0_13, %c0_14, %c0_15, %c0_16] : memref<1x1x2x128xi32, #tpu.memory_space<vmem>>, vector<1x1x2x128xi32>
    %12 = vector.shape_cast %11 : vector<1x1x2x128xi32> to vector<2x128xi32>
    %13 = arith.maximumf %4, %6 : vector<2x128xf32>
    %14 = arith.maximumf %13, %8 : vector<2x128xf32>
    %15 = arith.maximumf %14, %10 : vector<2x128xf32>
    %16 = arith.subf %4, %15 : vector<2x128xf32>
    %17 = math.exp %16 : vector<2x128xf32>
    %18 = arith.subf %6, %15 : vector<2x128xf32>
    %19 = math.exp %18 : vector<2x128xf32>
    %20 = arith.subf %8, %15 : vector<2x128xf32>
    %21 = math.exp %20 : vector<2x128xf32>
    %22 = arith.subf %10, %15 : vector<2x128xf32>
    %23 = math.exp %22 : vector<2x128xf32>
    %24 = arith.addf %17, %19 : vector<2x128xf32>
    %25 = arith.addf %24, %21 : vector<2x128xf32>
    %26 = arith.addf %25, %23 : vector<2x128xf32>
    %27 = tpu.reciprocal %26 {approx = true} : vector<2x128xf32> -> vector<2x128xf32>
    %28 = arith.mulf %17, %27 : vector<2x128xf32>
    %29 = arith.mulf %19, %27 : vector<2x128xf32>
    %30 = arith.mulf %21, %27 : vector<2x128xf32>
    %31 = arith.mulf %23, %27 : vector<2x128xf32>
    %c0_i32_17 = arith.constant 0 : i32
    %32 = vector.broadcast %c0_i32_17 : i32 to vector<2x128xi32>
    %33 = arith.cmpi eq, %12, %32 : vector<2x128xi32>
    %c1_i32 = arith.constant 1 : i32
    %34 = vector.broadcast %c1_i32 : i32 to vector<2x128xi32>
    %35 = arith.cmpi eq, %12, %34 : vector<2x128xi32>
    %c2_i32 = arith.constant 2 : i32
    %36 = vector.broadcast %c2_i32 : i32 to vector<2x128xi32>
    %37 = arith.cmpi eq, %12, %36 : vector<2x128xi32>
    %c3_i32 = arith.constant 3 : i32
    %38 = vector.broadcast %c3_i32 : i32 to vector<2x128xi32>
    %39 = arith.cmpi eq, %12, %38 : vector<2x128xi32>
    %cst = arith.constant 0.000000e+00 : f32
    %40 = vector.broadcast %cst : f32 to vector<2x128xf32>
    %41 = arith.select %33, %28, %40 : vector<2x128xi1>, vector<2x128xf32>
    %cst_18 = arith.constant dense<0.000000e+00> : vector<128xf32>
    %42 = vector.multi_reduction <add>, %41, %cst_18 [0] : vector<2x128xf32> to vector<128xf32>
    %43 = vector.shape_cast %42 : vector<128xf32> to vector<1x128xf32>
    %cst_19 = arith.constant dense<0.000000e+00> : vector<128xf32>
    %44 = vector.multi_reduction <add>, %28, %cst_19 [0] : vector<2x128xf32> to vector<128xf32>
    %45 = vector.shape_cast %44 : vector<128xf32> to vector<1x128xf32>
    %46 = arith.extui %33 : vector<2x128xi1> to vector<2x128xi32>
    %47 = arith.sitofp %46 : vector<2x128xi32> to vector<2x128xf32>
    %cst_20 = arith.constant dense<0.000000e+00> : vector<128xf32>
    %48 = vector.multi_reduction <add>, %47, %cst_20 [0] : vector<2x128xf32> to vector<128xf32>
    %49 = vector.shape_cast %48 : vector<128xf32> to vector<1x128xf32>
    %cst_21 = arith.constant 0.000000e+00 : f32
    %50 = vector.broadcast %cst_21 : f32 to vector<2x128xf32>
    %51 = arith.select %35, %29, %50 : vector<2x128xi1>, vector<2x128xf32>
    %cst_22 = arith.constant dense<0.000000e+00> : vector<128xf32>
    %52 = vector.multi_reduction <add>, %51, %cst_22 [0] : vector<2x128xf32> to vector<128xf32>
    %53 = vector.shape_cast %52 : vector<128xf32> to vector<1x128xf32>
    %cst_23 = arith.constant dense<0.000000e+00> : vector<128xf32>
    %54 = vector.multi_reduction <add>, %29, %cst_23 [0] : vector<2x128xf32> to vector<128xf32>
    %55 = vector.shape_cast %54 : vector<128xf32> to vector<1x128xf32>
    %56 = arith.extui %35 : vector<2x128xi1> to vector<2x128xi32>
    %57 = arith.sitofp %56 : vector<2x128xi32> to vector<2x128xf32>
    %cst_24 = arith.constant dense<0.000000e+00> : vector<128xf32>
    %58 = vector.multi_reduction <add>, %57, %cst_24 [0] : vector<2x128xf32> to vector<128xf32>
    %59 = vector.shape_cast %58 : vector<128xf32> to vector<1x128xf32>
    %cst_25 = arith.constant 0.000000e+00 : f32
    %60 = vector.broadcast %cst_25 : f32 to vector<2x128xf32>
    %61 = arith.select %37, %30, %60 : vector<2x128xi1>, vector<2x128xf32>
    %cst_26 = arith.constant dense<0.000000e+00> : vector<128xf32>
    %62 = vector.multi_reduction <add>, %61, %cst_26 [0] : vector<2x128xf32> to vector<128xf32>
    %63 = vector.shape_cast %62 : vector<128xf32> to vector<1x128xf32>
    %cst_27 = arith.constant dense<0.000000e+00> : vector<128xf32>
    %64 = vector.multi_reduction <add>, %30, %cst_27 [0] : vector<2x128xf32> to vector<128xf32>
    %65 = vector.shape_cast %64 : vector<128xf32> to vector<1x128xf32>
    %66 = arith.extui %37 : vector<2x128xi1> to vector<2x128xi32>
    %67 = arith.sitofp %66 : vector<2x128xi32> to vector<2x128xf32>
    %cst_28 = arith.constant dense<0.000000e+00> : vector<128xf32>
    %68 = vector.multi_reduction <add>, %67, %cst_28 [0] : vector<2x128xf32> to vector<128xf32>
    %69 = vector.shape_cast %68 : vector<128xf32> to vector<1x128xf32>
    %cst_29 = arith.constant 0.000000e+00 : f32
    %70 = vector.broadcast %cst_29 : f32 to vector<2x128xf32>
    %71 = arith.select %39, %31, %70 : vector<2x128xi1>, vector<2x128xf32>
    %cst_30 = arith.constant dense<0.000000e+00> : vector<128xf32>
    %72 = vector.multi_reduction <add>, %71, %cst_30 [0] : vector<2x128xf32> to vector<128xf32>
    %73 = vector.shape_cast %72 : vector<128xf32> to vector<1x128xf32>
    %cst_31 = arith.constant dense<0.000000e+00> : vector<128xf32>
    %74 = vector.multi_reduction <add>, %31, %cst_31 [0] : vector<2x128xf32> to vector<128xf32>
    %75 = vector.shape_cast %74 : vector<128xf32> to vector<1x128xf32>
    %76 = arith.extui %39 : vector<2x128xi1> to vector<2x128xi32>
    %77 = arith.sitofp %76 : vector<2x128xi32> to vector<2x128xf32>
    %cst_32 = arith.constant dense<0.000000e+00> : vector<128xf32>
    %78 = vector.multi_reduction <add>, %77, %cst_32 [0] : vector<2x128xf32> to vector<128xf32>
    %79 = vector.shape_cast %78 : vector<128xf32> to vector<1x128xf32>
    %c0_33 = arith.constant 0 : index
    %c0_34 = arith.constant 0 : index
    %c0_35 = arith.constant 0 : index
    %c0_36 = arith.constant 0 : index
    %80 = vector.load %arg4[%c0_33, %c0_34, %c0_35, %c0_36] : memref<1x3x4x128xf32, #tpu.memory_space<vmem>>, vector<1x1x4x128xf32>
    %81 = vector.shape_cast %80 : vector<1x1x4x128xf32> to vector<4x128xf32>
    %82 = tpu.concatenate %43, %53, %63, %73 in 0 : vector<1x128xf32>, vector<1x128xf32>, vector<1x128xf32>, vector<1x128xf32> -> vector<4x128xf32>
    %83 = arith.addf %81, %82 : vector<4x128xf32>
    %c0_37 = arith.constant 0 : index
    %c0_38 = arith.constant 0 : index
    %c0_39 = arith.constant 0 : index
    %c0_40 = arith.constant 0 : index
    %84 = vector.load %arg4[%c0_37, %c0_38, %c0_39, %c0_40] : memref<1x3x4x128xf32, #tpu.memory_space<vmem>>, vector<1x1x4x128xf32>
    %85 = vector.shape_cast %84 : vector<1x1x4x128xf32> to vector<4x128xf32>
    %86 = vector.shape_cast %83 : vector<4x128xf32> to vector<1x1x4x128xf32>
    tpu.vector_store %arg4[%c0_37, %c0_38, %c0_39, %c0_40], %86 {strides = array<i32>} : memref<1x3x4x128xf32, #tpu.memory_space<vmem>>, vector<1x1x4x128xf32>,
    %c0_41 = arith.constant 0 : index
    %c1_42 = arith.constant 1 : index
    %c0_43 = arith.constant 0 : index
    %c0_44 = arith.constant 0 : index
    %87 = vector.load %arg4[%c0_41, %c1_42, %c0_43, %c0_44] : memref<1x3x4x128xf32, #tpu.memory_space<vmem>>, vector<1x1x4x128xf32>
    %88 = vector.shape_cast %87 : vector<1x1x4x128xf32> to vector<4x128xf32>
    %89 = tpu.concatenate %45, %55, %65, %75 in 0 : vector<1x128xf32>, vector<1x128xf32>, vector<1x128xf32>, vector<1x128xf32> -> vector<4x128xf32>
    %90 = arith.addf %88, %89 : vector<4x128xf32>
    %c0_45 = arith.constant 0 : index
    %c1_46 = arith.constant 1 : index
    %c0_47 = arith.constant 0 : index
    %c0_48 = arith.constant 0 : index
    %91 = vector.load %arg4[%c0_45, %c1_46, %c0_47, %c0_48] : memref<1x3x4x128xf32, #tpu.memory_space<vmem>>, vector<1x1x4x128xf32>
    %92 = vector.shape_cast %91 : vector<1x1x4x128xf32> to vector<4x128xf32>
    %93 = vector.shape_cast %90 : vector<4x128xf32> to vector<1x1x4x128xf32>
    tpu.vector_store %arg4[%c0_45, %c1_46, %c0_47, %c0_48], %93 {strides = array<i32>} : memref<1x3x4x128xf32, #tpu.memory_space<vmem>>, vector<1x1x4x128xf32>,
    %c0_49 = arith.constant 0 : index
    %c2_50 = arith.constant 2 : index
    %c0_51 = arith.constant 0 : index
    %c0_52 = arith.constant 0 : index
    %94 = vector.load %arg4[%c0_49, %c2_50, %c0_51, %c0_52] : memref<1x3x4x128xf32, #tpu.memory_space<vmem>>, vector<1x1x4x128xf32>
    %95 = vector.shape_cast %94 : vector<1x1x4x128xf32> to vector<4x128xf32>
    %96 = tpu.concatenate %49, %59, %69, %79 in 0 : vector<1x128xf32>, vector<1x128xf32>, vector<1x128xf32>, vector<1x128xf32> -> vector<4x128xf32>
    %97 = arith.addf %95, %96 : vector<4x128xf32>
    %c0_53 = arith.constant 0 : index
    %c2_54 = arith.constant 2 : index
    %c0_55 = arith.constant 0 : index
    %c0_56 = arith.constant 0 : index
    %98 = vector.load %arg4[%c0_53, %c2_54, %c0_55, %c0_56] : memref<1x3x4x128xf32, #tpu.memory_space<vmem>>, vector<1x1x4x128xf32>
    %99 = vector.shape_cast %98 : vector<1x1x4x128xf32> to vector<4x128xf32>
    %100 = vector.shape_cast %97 : vector<4x128xf32> to vector<1x1x4x128xf32>
    tpu.vector_store %arg4[%c0_53, %c2_54, %c0_55, %c0_56], %100 {strides = array<i32>} : memref<1x3x4x128xf32, #tpu.memory_space<vmem>>, vector<1x1x4x128xf32>,
    return
  }
  func.func @transform_0(%arg0: i32, %arg1: i32) -> (i32, i32, i32, i32) {
    %c0_i32 = arith.constant 0 : i32
    %c0_i32_0 = arith.constant 0 : i32
    %c0_i32_1 = arith.constant 0 : i32
    return %arg0, %c0_i32, %arg1, %c0_i32_0 : i32, i32, i32, i32
  }
  func.func @transform_1(%arg0: i32, %arg1: i32) -> (i32, i32, i32, i32) {
    %c0_i32 = arith.constant 0 : i32
    %c0_i32_0 = arith.constant 0 : i32
    %c0_i32_1 = arith.constant 0 : i32
    return %arg0, %c0_i32, %arg1, %c0_i32_0 : i32, i32, i32, i32
  }
  func.func @transform_2(%arg0: i32, %arg1: i32) -> (i32, i32, i32, i32) {
    %c0_i32 = arith.constant 0 : i32
    %c0_i32_0 = arith.constant 0 : i32
    %c0_i32_1 = arith.constant 0 : i32
    %c0_i32_2 = arith.constant 0 : i32
    return %arg0, %c0_i32, %c0_i32_0, %c0_i32_1 : i32, i32, i32, i32
  }
}

</mosaic_0001>

<bundles_post_ra>
// kernel: tpu_custom_call.1
= control target key start
LH: loop header
LB: loop body
LE: loop exit
PB: predicated region body
PF: predicated region fallthrough
CT: control target
= control target key end

     0   :  { %7 = vsyncpa [#allocation3], 0  ;;  %s978_s0 = inlined_call_operand.hbm [shape: f32[2,4,2,128], index: 0, kind: input, shape index: {}]   ;;  %s979_s1 = inlined_call_operand.hbm [shape: s32[2,1,2,128], index: 1, kind: input, shape index: {}]   ;;  %s980_s2 = inlined_call_operand.hbm [shape: f32[2,3,4,128], index: 2, kind: output, shape index: {}]  }
   0x1   :  { %9 = vsyncpa [#allocation3 + $0x1], 0 }
   0x2   :  { %10 = vsyncpa [#allocation6], 0 }
   0x3   :  { %12 = vsyncpa [#allocation6 + $0x1], 0 }
   0x4   :  { %13 = vsyncpa [#allocation4], 0 }
   0x5   :  { %15 = vsyncpa [#allocation4 + $0x1], 0  ;;  %s784_s9 = smov 0   ;;  %s786_s10 = smov 0  }
   0x6   :  { %s788_s11 = smov 0   ;;  %s790_s12 = smov 0  }
   0x7   :  { %s792_s13 = smov 0   ;;  %s794_s14 = smov 0  }
   0x8 LB: > { %s505_s15 = sadd.s32 4294967295, %s762_s14   ;;  %s506_s16 = sadd.s32 4294967294, %s762_s14   ;;  %s762_s14 = sphi %s794_s14, %s21_s14   ;;  %s758_s13 = sphi %s792_s13, %s990_s13   ;;  %s754_s12 = sphi %s790_s12, %s989_s12   ;;  %s750_s11 = sphi %s788_s11, %s988_s11   ;;  %s746_s10 = sphi %s786_s10, %s987_s10   ;;  %s742_s9 = sphi %s784_s9, %s986_s9  }
   0x9   : > { %s33_s17 = sadd.s32 1, %s758_s13  ;;  %s42_s18 = sadd.s32 1, %s750_s11 }
   0xa   : > { %p35_p0 = scmp.ge.s32.totalorder %s33_s17, 2  ;;  %p49_p1 = scmp.ne.s32.totalorder %s750_s11, %s746_s10 }
   0xb   : > { %p50_p2 = scmp.eq.s32.totalorder %s762_s14, 0  ;;  %p55_p3 = scmp.ne.s32.totalorder %s746_s10, %s742_s9 }
   0xc   : > { %s992_s17 = smov (%p35_p0, %s33_s17), 0  ;;  %p56_p5 = scmp.eq.s32.totalorder %s505_s15, 0 }
   0xd   : > { %p825_p4 = por %p50_p2, %p49_p1  ;;  %s37_s20 = ssub.s32 %s758_s13, %s992_s17 }
   0xe   : > { %p107_p6 = scmp.eq.s32.totalorder %s505_s15, 1  ;;  %p40_p7 = scmp.eq.s32.totalorder %s37_s20, 0 }
   0xf   : > { %p831_p8 = por %p56_p5, %p55_p3  ;;  %p113_p10 = scmp.eq.s32.totalorder %s506_s16, 1 }
  0x10   : > { %p835_p9 = por %p107_p6, %p49_p1  ;;  %p508_p12 = scmp.ge.s32.totalorder %s762_s14, 2 }
  0x11   : > { %s840_s23 = scalar_select %p40_p7, %s750_s11, %s42_s18  }
  0x12   : > { %p842_p11 = por %p113_p10, %p55_p3  ;;  %p551_p13 = scmp.lt.s32.totalorder %s762_s14, 2 }
  0x13   : > { %s133_s25 = sand.u32 1, %s750_s11   ;;  %s531_s27 = sshll.u32 %s758_s13, 3 }
  0x14   : > { %s509_s26 = sshll.u32 %s133_s25, 3  ;;  %s143_s30 = scalar_lea.hbm %s978_s0, %s531_s27 }
  0x15   : > { %s137_s3 = scalar_lea.vmem [#allocation2], %s509_s26  ;;  %s144_s5 = sshll.u32 %s143_s30, 4  ;;  %s145_s5 = int_to_ptr.hbm [resolvable:$true] %s144_s5 }
  0x16   : > { %s146_s4 = sshll.u32 %s137_s3, 4  ;;  %p855_p0 = pnand %p551_p13, %p825_p4  ;;  %s147_s4 = int_to_ptr.vmem [resolvable:$true] %s146_s4 }
  0x17   : > { %p514_p1 = scmp.ge.s32.totalorder %s762_s14, 1  ;;  %s134_s7 = scalar_lea.sflag [#allocation3], %s133_s25 }
  0x18   : > { %s764_s8 = smov 32   ;;  %s765_s15 = smov 2  }
  0x19   : > { %543 = dma.hbm_to_vmem [thread:$0]  (!%p855_p0), %s145_s5, 128, %s147_s4, %s134_s7, %s764_s8, %s764_s8, %s765_s15  }
  0x1a   : > { %p174_p2 = scmp.lt.s32.totalorder %s762_s14, 3  ;;  %s512_s16 = sshll.u32 %s133_s25, 1 }
  0x1b   : > { %s513_s18 = sshll.u32 %s758_s13, 1  ;;  %s160_s27 = scalar_lea.vmem [#allocation5], %s512_s16 }
  0x1c   : > { %p175_p3 = pnand %p514_p1, %p174_p2  ;;  %s165_s19 = scalar_lea.hbm %s979_s1, %s513_s18 }
  0x1d   : > { %s169_s28 = sshll.u32 %s160_s27, 4  ;;  %s167_s29 = sshll.u32 %s165_s19, 4  ;;  %s170_s28 = int_to_ptr.vmem [resolvable:$true] %s169_s28  ;;  %s168_s29 = int_to_ptr.hbm [resolvable:$true] %s167_s29 }
  0x1e   : > { %s157_s30 = scalar_lea.sflag [#allocation6], %s133_s25  ;;  %178 = sbr.rel (%p175_p3) target bundleno = 100 (0x64), region = 28 }
  0x1f   : > { %546 = dma.hbm_to_vmem [thread:$0]  (!%p855_p0), %s168_s29, 32, %s170_s28, %s157_s30  }
  0x20   : > { %s870_s3 = sand.u32 (!%p175_p3), 1, %s746_s10  }
  0x21   : > { %s515_s4 = sshll.u32 (!%p175_p3), %s870_s3, 3  ;;  %s181_s5 = scalar_lea.sflag (!%p175_p3), [#allocation3], %s870_s3 }
  0x22   : > { %s184_s7 = scalar_lea.vmem (!%p175_p3), [#allocation2], %s515_s4 }
  0x23   : > { %729 = dma.done.wait (%p831_p8), %s181_s5, 128  }
  0x24   : > { %731 = vsyncadd (%p831_p8), %s181_s5, 4294967168  ;;  %s516_s25 = sshll.u32 %s870_s3, 1  ;;  %s191_s6 = scalar_lea.sflag [#allocation6], %s870_s3 }
  0x25   : > { %s194_s8 = scalar_lea.vmem [#allocation5], %s516_s25 }
  0x26   : > { %733 = dma.done.wait (%p831_p8), %s191_s6, 32  }
  0x27   : > { %735 = vsyncadd (%p831_p8), %s191_s6, 4294967264  ;;  %s532_s15 = smul.u32 12, %s870_s3  ;;  %v766_v0 = vmov 0.0   ;;  %v228_v1 = vld [vmem:[%s184_s7] sm:$0x3]  ;;  %vm264_vm3 = vcmask 1041408  }
  0x28   : > { %v517_v2 = vld [vmem:[%s184_s7 + $0x2] sm:$0x3]  ;;  %v518_v3 = vld [vmem:[%s184_s7 + $0x4] sm:$0x3]  ;;  %v890_v4 = vld [vmem:[%s194_s8] sm:$0x3] }
  0x29   : > { %s885_s16 = scalar_lea.vmem [#allocation7], %s532_s15  ;;  %v236_v5 = vmax.f32 %v228_v1, %v517_v2  ;;  %v519_v6 = vld [vmem:[%s184_s7 + $0x6] sm:$0x3]  ;;  %vm259_vm0 = vcmp.eq.s32.totalorder %v890_v4, 0  ;;  %vm260_vm1 = vcmp.eq.s32.totalorder %v890_v4, 1  ;;  %vm261_vm2 = vcmp.eq.s32.totalorder %v890_v4, 2 }
  0x2a   : > { %225 = vst [vmem:[%s885_s16] sm:$0xf] %v766_v0  ;;  %vm262_vm4 = vcmp.eq.s32.totalorder %v890_v4, 3  ;;  %v520_v9 = vsel %vm259_vm0, 1.0, %v766_v0  ;;  %v521_v10 = vsel %vm260_vm1, 1.0, %v766_v0  ;;  %v522_v13 = vsel %vm261_vm2, 1.0, %v766_v0  ;;  %s533_s21 = smul.u32 12, %s754_s12 }
  0x2b   : > { %226 = vst [vmem:[%s885_s16 + $0x4] sm:$0xf] %v766_v0  ;;  %v237_v7 = vmax.f32 %v236_v5, %v518_v3  ;;  %v281_v11 = vsel %vm264_vm3, %v520_v9, 0.0  ;;  %v305_v12 = vsel %vm264_vm3, %v521_v10, 0.0  ;;  %v329_v20 = vsel %vm264_vm3, %v522_v13, 0.0  ;;  %s395_s26 = sshll.u32 %s885_s16, 4  ;;  %s396_s26 = int_to_ptr.vmem [resolvable:$true] %s395_s26 }
  0x2c   : > { %227 = vst [vmem:[%s885_s16 + $0x8] sm:$0xf] %v766_v0  ;;  %v282_v18 = vrot.slane %v281_v11, 4  ;;  %v306_v19 = vrot.slane %v305_v12, 4  ;;  %v523_v21 = vsel %vm262_vm4, 1.0, %v766_v0  ;;  %v330_v28 = vrot.slane %v329_v20, 4  ;;  %s394_s20 = scalar_lea.hbm %s980_s2, %s533_s21 }
  0x2d   : > { %v238_v8 = vmax.f32 %v237_v7, %v519_v6  ;;  %v353_v29 = vsel %vm264_vm3, %v523_v21, 0.0  ;;  %vm361_vm5 = vcmask 1040384   ;;  %vm364_vm6 = vcmask 1042432   ;;  %s397_s19 = sshll.u32 %s394_s20, 4  ;;  %s383_s27 = scalar_lea.sflag [#allocation4], %s870_s3  ;;  %s398_s19 = int_to_ptr.hbm [resolvable:$true] %s397_s19 }
  0x2e   : > { %v283_v26 = vadd.f32 %v282_v18, %v281_v11  ;;  %v307_v27 = vadd.f32 %v306_v19, %v305_v12  ;;  %v331_v32 = vadd.f32 %v330_v28, %v329_v20  ;;  %v354_v33 = vrot.slane %v353_v29, 4  ;;  %s690_s28 = sshra.s32 %s398_s19, 4  ;;  %s696_s5 = scalar_lea.hbm %s980_s2, 24  ;;  %s691_s28 = int_to_ptr.hbm [resolvable:$true] %s690_s28 }
  0x2f   : > { %v239_v14 = vsub.f32 %v228_v1, %v238_v8  ;;  %v242_v15 = vsub.f32 %v517_v2, %v238_v8  ;;  %v245_v16 = vsub.f32 %v518_v3, %v238_v8  ;;  %v248_v17 = vsub.f32 %v519_v6, %v238_v8  ;;  %s692_s29 = scalar_lea.hbm %s691_s28, 12  ;;  %p697_p7 = scmp.lt.s32.totalorder %s691_s28, %s980_s2 }
  0x30   : > { %v284_v30 = vrot.slane %v283_v26, 2  ;;  %v308_v31 = vrot.slane %v307_v27, 2  ;;  %v332_v36 = vrot.slane %v331_v32, 2  ;;  %v355_v37 = vadd.f32 %v354_v33, %v353_v29  ;;  %p693_p4 = scmp.ne.s32.totalorder %s691_s28, %s692_s29  ;;  %p698_p8 = scmp.lt.s32.totalorder %s696_s5, %s692_s29 }
  0x31   : > { %v240_v22 = vmul.f32 1.442695, %v239_v14  ;;  %v243_v23 = vmul.f32 1.442695, %v242_v15  ;;  %v246_v24 = vmul.f32 1.442695, %v245_v16 }
  0x32   : > { %v249_v25 = vmul.f32 1.442695, %v248_v17  ;;  %v285_v34 = vadd.f32 %v284_v30, %v283_v26  ;;  %v309_v35 = vadd.f32 %v308_v31, %v307_v27  ;;  %v333_v41 = vadd.f32 %v332_v36, %v331_v32  ;;  %p694_p5 = pnand %p693_p4, %p835_p9  ;;  %p699_p10 = por %p698_p8, %p697_p7 }
  0x33   : > { %606 = vpow2.f32 %v240_v22  ;;  %v356_v42 = vrot.slane %v355_v37, 2  ;;  %v526_v57 = vld [vmem:[%s885_s16 + $0x8] sm:$0xf] }
  0x34   : > { %608 = vpow2.f32 %v243_v23  ;;  %v286_v38 = vrot.slane %v285_v34, 1  ;;  %v310_v39 = vrot.slane %v309_v35, 1  ;;  %v334_v48 = vrot.slane %v333_v41, 1  ;;  %p695_p6 = pneg %p694_p5 }
  0x35   : > { %610 = vpow2.f32 %v246_v24  ;;  %v357_v49 = vadd.f32 %v356_v42, %v355_v37 }
  0x36   : > { %612 = vpow2.f32 %v249_v25  ;;  %v287_v44 = vadd.f32 %v286_v38, %v285_v34  ;;  %v311_v45 = vadd.f32 %v310_v39, %v309_v35  ;;  %v335_v53 = vadd.f32 %v334_v48, %v333_v41  ;;  %p700_p13 = pnand %p699_p10, %p695_p6 }
  0x37   : > { %v358_v54 = vrot.slane %v357_v49, 1 }
  0x38   : > { %v377_v51 = vsel %vm361_vm5, %v287_v44, %v311_v45 }
  0x39   : > { %v607_v40 = vpop.eup %606  ;;  %v359_v56 = vadd.f32 %v358_v54, %v357_v49  ;;  %v378_v58 = vsel %vm264_vm3, %v377_v51, %v335_v53 }
  0x3a   : > { %v609_v43 = vpop.eup %608 }
  0x3b   : > { %v611_v46 = vpop.eup %610  ;;  %v251_v47 = vadd.f32 %v609_v43, %v607_v40  ;;  %v379_v59 = vsel %vm364_vm6, %v378_v58, %v359_v56  ;;  %v360_v58 = vld [vmem:[%s885_s16] sm:$0xf] }
  0x3c   : > { %v613_v50 = vpop.eup %612  ;;  %v380_v60 = vadd.f32 %v526_v57, %v379_v59 }
  0x3d   : > { %v252_v52 = vadd.f32 %v611_v46, %v251_v47 }
  0x3e   : > { %527 = vst [vmem:[%s885_s16 + $0x8] sm:$0xf] %v380_v60 }
  0x3f   : > { %v253_v55 = vadd.f32 %v613_v50, %v252_v52 }
  0x41   : > { %614 = vrcp.f32 %v253_v55 }
  0x47   : > { %v615_v61 = vpop.eup %614 }
  0x48   : > { %v255_v62 = vmul.f32 %v615_v61, %v607_v40  ;;  %v256_v63 = vmul.f32 %v615_v61, %v609_v43  ;;  %v257_v0 = vmul.f32 %v615_v61, %v611_v46  ;;  %v258_v1 = vmul.f32 %v615_v61, %v613_v50 }
  0x4a   : > { %v263_v2 = vsel %vm259_vm0, %v255_v62, 0.0  ;;  %v288_v3 = vsel %vm260_vm1, %v256_v63, 0.0  ;;  %v312_v5 = vsel %vm261_vm2, %v257_v0, 0.0  ;;  %v336_v6 = vsel %vm262_vm4, %v258_v1, 0.0 }
  0x4b   : > { %v265_v7 = vsel %vm264_vm3, %v263_v2, 0.0  ;;  %v289_v8 = vsel %vm264_vm3, %v288_v3, 0.0  ;;  %v313_v9 = vsel %vm264_vm3, %v312_v5, 0.0  ;;  %v337_v10 = vsel %vm264_vm3, %v336_v6, 0.0  ;;  %v524_v3 = vld [vmem:[%s885_s16 + $0x4] sm:$0xf] }
  0x4c   : > { %v266_v11 = vrot.slane %v265_v7, 4  ;;  %v290_v12 = vrot.slane %v289_v8, 4  ;;  %v314_v13 = vrot.slane %v313_v9, 4  ;;  %v338_v14 = vrot.slane %v337_v10, 4 }
  0x4d   : > { %v272_v15 = vsel %vm264_vm3, %v255_v62, 0.0  ;;  %v296_v16 = vsel %vm264_vm3, %v256_v63, 0.0  ;;  %v320_v17 = vsel %vm264_vm3, %v257_v0, 0.0  ;;  %v344_v4 = vsel %vm264_vm3, %v258_v1, 0.0 }
  0x4e   : > { %v267_v18 = vadd.f32 %v266_v11, %v265_v7  ;;  %v291_v19 = vadd.f32 %v290_v12, %v289_v8  ;;  %v315_v20 = vadd.f32 %v314_v13, %v313_v9  ;;  %v339_v21 = vadd.f32 %v338_v14, %v337_v10 }
  0x4f   : > { %v273_v22 = vrot.slane %v272_v15, 4  ;;  %v297_v23 = vrot.slane %v296_v16, 4  ;;  %v321_v24 = vrot.slane %v320_v17, 4  ;;  %v345_v25 = vrot.slane %v344_v4, 4 }
  0x50   : > { %v268_v26 = vrot.slane %v267_v18, 2  ;;  %v292_v27 = vrot.slane %v291_v19, 2  ;;  %v316_v28 = vrot.slane %v315_v20, 2  ;;  %v340_v29 = vrot.slane %v339_v21, 2 }
  0x51   : > { %v274_v30 = vadd.f32 %v273_v22, %v272_v15  ;;  %v298_v31 = vadd.f32 %v297_v23, %v296_v16  ;;  %v322_v32 = vadd.f32 %v321_v24, %v320_v17  ;;  %v346_v33 = vadd.f32 %v345_v25, %v344_v4 }
  0x52   : > { %v269_v34 = vadd.f32 %v268_v26, %v267_v18  ;;  %v293_v35 = vadd.f32 %v292_v27, %v291_v19  ;;  %v317_v36 = vadd.f32 %v316_v28, %v315_v20  ;;  %v341_v37 = vadd.f32 %v340_v29, %v339_v21 }
  0x53   : > { %v275_v38 = vrot.slane %v274_v30, 2  ;;  %v299_v39 = vrot.slane %v298_v31, 2  ;;  %v323_v40 = vrot.slane %v322_v32, 2  ;;  %v347_v41 = vrot.slane %v346_v33, 2 }
  0x54   : > { %v270_v42 = vrot.slane %v269_v34, 1  ;;  %v294_v43 = vrot.slane %v293_v35, 1  ;;  %v318_v44 = vrot.slane %v317_v36, 1  ;;  %v342_v45 = vrot.slane %v341_v37, 1 }
  0x55   : > { %v276_v46 = vadd.f32 %v275_v38, %v274_v30  ;;  %v300_v47 = vadd.f32 %v299_v39, %v298_v31  ;;  %v324_v48 = vadd.f32 %v323_v40, %v322_v32  ;;  %v348_v49 = vadd.f32 %v347_v41, %v346_v33 }
  0x56   : > { %v271_v50 = vadd.f32 %v270_v42, %v269_v34  ;;  %v295_v51 = vadd.f32 %v294_v43, %v293_v35  ;;  %v319_v52 = vadd.f32 %v318_v44, %v317_v36  ;;  %v343_v53 = vadd.f32 %v342_v45, %v341_v37 }
  0x57   : > { %v277_v54 = vrot.slane %v276_v46, 1  ;;  %v301_v55 = vrot.slane %v300_v47, 1  ;;  %v325_v56 = vrot.slane %v324_v48, 1  ;;  %v349_v57 = vrot.slane %v348_v49, 1 }
  0x58   : > { %v362_v59 = vsel %vm361_vm5, %v271_v50, %v295_v51 }
  0x59   : > { %v363_v60 = vsel %vm264_vm3, %v362_v59, %v319_v52  ;;  %v278_v61 = vadd.f32 %v277_v54, %v276_v46  ;;  %v302_v62 = vadd.f32 %v301_v55, %v300_v47  ;;  %v326_v63 = vadd.f32 %v325_v56, %v324_v48 }
  0x5a   : > { %v365_v0 = vsel %vm364_vm6, %v363_v60, %v343_v53  ;;  %v350_v1 = vadd.f32 %v349_v57, %v348_v49 }
  0x5b   : > { %v366_v2 = vadd.f32 %v365_v0, %v360_v58  ;;  %v370_v5 = vsel %vm361_vm5, %v278_v61, %v302_v62 }
  0x5c   : > { %v371_v6 = vsel %vm264_vm3, %v370_v5, %v326_v63 }
  0x5d   : > { %367 = vst [vmem:[%s885_s16] sm:$0xf] %v366_v2  ;;  %v372_v7 = vsel %vm364_vm6, %v371_v6, %v350_v1 }
  0x5e   : > { %v373_v8 = vadd.f32 %v524_v3, %v372_v7 }
  0x60   : > { %525 = vst [vmem:[%s885_s16 + $0x4] sm:$0xf] %v373_v8 }
  0x61   : > { %703 = shalt.err (!%p700_p13)
}
  0x62   : > { %s767_s3 = smov 64   ;;  %s768_s6 = smov 4  }
  0x63   : > { %538 = dma.vmem_to_hbm [thread:$0]  (%p835_p9), %s396_s26, 192, %s398_s19, %s383_s27, %s767_s3, %s767_s3, %s768_s6  }
  0x64 PF: > { %s412_s8 = sand.u32 1, %s742_s9   ;;  %p548_p0 = pnand %p508_p12, %p842_p11 }
  0x65   : > { %s413_s15 = scalar_lea.sflag [#allocation4], %s412_s8 }
  0x66   : > { %p549_p1 = pneg %p548_p0 }
  0x68   : > { %737 = dma.done.wait (%p549_p1), %s413_s15, 192  }
  0x69   : > { %739 = vsyncadd (%p549_p1), %s413_s15, 4294967104  ;;  %s21_s14 = sadd.s32 1, %s762_s14   ;;  %s986_s9 = smov %s746_s10 }
  0x6a   : > { %p18_p2 = scmp.ge.s32.totalorder %s21_s14, 4   ;;  %s987_s10 = smov %s750_s11 }
  0x6b   : > { %s988_s11 = smov %s840_s23  ;;  %s989_s12 = smov %s758_s13 }
  0x6c   : > { %s990_s13 = smov %s992_s17  ;;  %20 = sbr.rel (!%p18_p2) target bundleno = 8 (0x8), region = 95 }
  0x71   :  { %419 = vsyncpa [#allocation3], 1 }
  0x72   :  { %421 = vsyncpa [#allocation3 + $0x1], 1 }
  0x73   :  { %422 = vsyncpa [#allocation6], 1 }
  0x74   :  { %424 = vsyncpa [#allocation6 + $0x1], 1 }
  0x75   :  { %425 = vsyncpa [#allocation4], 1 }
  0x76   :  { %427 = vsyncpa [#allocation4 + $0x1], 1 }

</bundles_post_ra>
